<compile_context>
chip_gen: v7x
topology: tpu7x:2x2x1
jax: 0.10.0
libtpu: 0.0.40
codegen_flags: <defaults>
</compile_context>

<pallas_src>
import jax
import jax.numpy as jnp
from jax.experimental import pallas as pl
from jax.experimental.pallas import tpu as pltpu

_IMAGENET_MEAN = (0.485, 0.456, 0.406)   # cancels out in the difference
_IMAGENET_STD = (0.229, 0.224, 0.225)
# fold the (x+1)/2 scaling and the per-channel 1/std into one squared weight
_CH_W = tuple((0.5 / s) ** 2 for s in _IMAGENET_STD)


def _pixel_distance_kernel(p_ref, g_ref, out_ref, acc_ref):
    i = pl.program_id(0)          # row-tile axis ("parallel")
    j = pl.program_id(1)          # column-tile axis ("arbitrary" reduction)

    @pl.when(j == 0)
    def _init():
        acc_ref[...] = jnp.zeros_like(acc_ref)

    # Upcast in-vreg (inputs may be bf16); per-element work is sub + 2 mul + add.
    diff = p_ref[...].astype(jnp.float32) - g_ref[...].astype(jnp.float32)

    # Per-row channel weight: channel = global_row % 3 (rows are B*C, C inner).
    tm = p_ref.shape[0]
    row = jax.lax.broadcasted_iota(jnp.int32, (tm, 1), 0) + i * tm
    ch = row % 3
    w = jnp.where(ch == 0, _CH_W[0], jnp.where(ch == 1, _CH_W[1], _CH_W[2]))

    acc_ref[...] += diff * diff * w

    @pl.when(j == pl.num_programs(1) - 1)
    def _finalize():
        s = jnp.sum(acc_ref[...])   # one XLU reduce per row group, not per tile
        out_ref[...] = jnp.full(out_ref.shape, s, dtype=out_ref.dtype)


def _largest_tile(n, unit, cap):
    """Largest multiple of `unit` that divides n and is <= max(unit, cap)."""
    t = min(n, max(unit, (cap // unit) * unit))
    while n % t:
        t -= unit
    return t


def pixel_distance_loss(pred, gt, *, tm=None, tn=None):
    """pred, gt: (B, 3, H, W) float arrays in [-1, 1] (NCHW)."""
    B, C, H, W = pred.shape
    assert C == 3, "PixelDistanceLoss uses 3-channel ImageNet normalization"
    HW = H * W
    R = B * C

    p2 = pred.reshape(R, HW)
    g2 = gt.reshape(R, HW)

    # Pad to (8, 128) multiples only when needed; zero pads contribute nothing
    # to the weighted squared-difference sum.
    Rp = -(-R // 8) * 8
    HWp = -(-HW // 128) * 128
    if (Rp, HWp) != (R, HW):
        p2 = jnp.pad(p2, ((0, Rp - R), (0, HWp - HW)))
        g2 = jnp.pad(g2, ((0, Rp - R), (0, HWp - HW)))

    if tm is None:
        tm = _largest_tile(Rp, 8, 256)
    if tn is None:
        # ~2 MiB per (tm, tn) f32 buffer: 2 inputs x 2 buffers + accumulator
        # stays ~10 MiB, within every generation's default scoped VMEM limit.
        tn = _largest_tile(HWp, 128, (2 << 20) // (4 * tm))

    n_i = Rp // tm
    n_j = HWp // tn

    partials = pl.pallas_call(
        _pixel_distance_kernel,
        out_shape=jax.ShapeDtypeStruct((n_i, 8, 128), jnp.float32),
        grid=(n_i, n_j),
        in_specs=[
            pl.BlockSpec((tm, tn), lambda i, j: (i, j)),
            pl.BlockSpec((tm, tn), lambda i, j: (i, j)),
        ],
        out_specs=pl.BlockSpec((1, 8, 128), lambda i, j: (i, 0, 0)),
        scratch_shapes=[pltpu.VMEM((tm, tn), jnp.float32)],
        compiler_params=pltpu.CompilerParams(
            dimension_semantics=("parallel", "arbitrary")),
    )(p2, g2)

    total = jnp.sum(partials[:, 0, 0])
    # per-sample MSE averages over C*H*W; mean over B => divide by B*C*H*W
    return total / jnp.float32(B * C * H * W)


def _reference(pred, gt):
    # pure-JAX reference matching the PyTorch loop exactly
    mean = jnp.array(_IMAGENET_MEAN, jnp.float32).reshape(1, 3, 1, 1)
    std = jnp.array(_IMAGENET_STD, jnp.float32).reshape(1, 3, 1, 1)
    predIm = (pred.astype(jnp.float32) + 1.0) / 2.0
    gtIm = (gt.astype(jnp.float32) + 1.0) / 2.0
    pn = (predIm - mean) / std
    gn = (gtIm - mean) / std
    per_sample = jnp.mean((pn - gn) ** 2, axis=(1, 2, 3))
    return jnp.mean(per_sample)


if __name__ == "__main__":
    key = jax.random.PRNGKey(0)
    k1, k2, k3, k4 = jax.random.split(key, 4)

    # Small shape implied by the module's forward: NCHW with 3 channels.
    B, C, H, W = 2, 3, 16, 16
    pred = jax.random.uniform(k1, (B, C, H, W), jnp.float32, minval=-1.0, maxval=1.0)
    gt = jax.random.uniform(k2, (B, C, H, W), jnp.float32, minval=-1.0, maxval=1.0)

    out = jax.block_until_ready(pixel_distance_loss(pred, gt))
    ref = jax.block_until_ready(_reference(pred, gt))
    assert jnp.allclose(out, ref, rtol=1e-5, atol=1e-5), (out, ref)

    # Exercise the multi-tile reduction path (n_i > 1, n_j > 1, row padding)
    # by forcing small tiles.
    B2 = 4
    pred2 = jax.random.uniform(k3, (B2, C, H, W), jnp.float32, minval=-1.0, maxval=1.0)
    gt2 = jax.random.uniform(k4, (B2, C, H, W), jnp.float32, minval=-1.0, maxval=1.0)
    out2 = jax.block_until_ready(pixel_distance_loss(pred2, gt2, tm=8, tn=128))
    ref2 = jax.block_until_ready(_reference(pred2, gt2))
    assert jnp.allclose(out2, ref2, rtol=1e-5, atol=1e-5), (out2, ref2)

    print("KERNEL_OK")
</pallas_src>

<mosaic_0001>
module attributes {stable_mosaic.version = 11 : i64} {
  func.func @_pixel_distance_kernel(%arg0: i32, %arg1: i32, %arg2: memref<8x256xf32, #tpu.memory_space<vmem>>, %arg3: memref<8x256xf32, #tpu.memory_space<vmem>>, %arg4: memref<1x8x128xf32, #tpu.memory_space<vmem>>, %arg5: memref<8x256xf32, #tpu.memory_space<vmem>>) attributes {dimension_semantics = [#tpu.dimension_semantics<parallel>, #tpu.dimension_semantics<arbitrary>], iteration_bounds = array<i64: 1, 1>, scalar_prefetch = 0 : i64, scratch_operands = 1 : i64, tpu.core_type = #tpu.core_type<tc>, window_params = [{transform_indices = @transform_0, window_bounds = array<i64: 8, 256>}, {transform_indices = @transform_1, window_bounds = array<i64: 8, 256>}, {transform_indices = @transform_2, window_bounds = array<i64: 1, 8, 128>}]} {
    %c0_i32 = arith.constant 0 : i32
    %0 = arith.cmpi eq, %arg1, %c0_i32 : i32
    %1 = arith.extui %0 : i1 to i32
    %c0_i32_0 = arith.constant 0 : i32
    %2 = arith.cmpi ne, %1, %c0_i32_0 : i32
    scf.if %2 {
      %cst_18 = arith.constant 0.000000e+00 : f32
      %44 = vector.broadcast %cst_18 : f32 to vector<8x256xf32>
      %c0_19 = arith.constant 0 : index
      %c0_20 = arith.constant 0 : index
      %45 = vector.load %arg5[%c0_19, %c0_20] : memref<8x256xf32, #tpu.memory_space<vmem>>, vector<8x256xf32>
      tpu.vector_store %arg5[%c0_19, %c0_20], %44 {strides = array<i32>} : memref<8x256xf32, #tpu.memory_space<vmem>>, vector<8x256xf32>,
    } else {
    }
    %c0 = arith.constant 0 : index
    %c0_1 = arith.constant 0 : index
    %3 = vector.load %arg2[%c0, %c0_1] : memref<8x256xf32, #tpu.memory_space<vmem>>, vector<8x256xf32>
    %c0_2 = arith.constant 0 : index
    %c0_3 = arith.constant 0 : index
    %4 = vector.load %arg3[%c0_2, %c0_3] : memref<8x256xf32, #tpu.memory_space<vmem>>, vector<8x256xf32>
    %5 = arith.subf %3, %4 : vector<8x256xf32>
    %6 = tpu.iota {dimensions = array<i32: 0>} : vector<8x1xi32>
    %c8_i32 = arith.constant 8 : i32
    %7 = arith.muli %arg0, %c8_i32 : i32
    %8 = vector.broadcast %7 : i32 to vector<8x1xi32>
    %9 = arith.addi %6, %8 : vector<8x1xi32>
    %c3_i32 = arith.constant 3 : i32
    %c0_i32_4 = arith.constant 0 : i32
    %10 = arith.cmpi eq, %c3_i32, %c0_i32_4 : i32
    %c1_i32 = arith.constant 1 : i32
    %11 = arith.select %10, %c1_i32, %c3_i32 : i32
    %12 = vector.broadcast %11 : i32 to vector<8x1xi32>
    %13 = arith.remsi %9, %12 : vector<8x1xi32>
    %c0_i32_5 = arith.constant 0 : i32
    %14 = vector.broadcast %c0_i32_5 : i32 to vector<8x1xi32>
    %15 = arith.cmpi ne, %13, %14 : vector<8x1xi32>
    %c0_i32_6 = arith.constant 0 : i32
    %16 = vector.broadcast %c0_i32_6 : i32 to vector<8x1xi32>
    %17 = arith.cmpi slt, %13, %16 : vector<8x1xi32>
    %c0_i32_7 = arith.constant 0 : i32
    %18 = arith.cmpi slt, %11, %c0_i32_7 : i32
    %19 = vector.broadcast %18 : i1 to vector<8x1xi1>
    %20 = vector.broadcast %19 : vector<8x1xi1> to vector<8x1xi1>
    %21 = arith.xori %17, %20 : vector<8x1xi1>
    %22 = arith.andi %21, %15 : vector<8x1xi1>
    %23 = vector.broadcast %11 : i32 to vector<8x1xi32>
    %24 = arith.addi %13, %23 : vector<8x1xi32>
    %25 = arith.select %22, %24, %13 : vector<8x1xi1>, vector<8x1xi32>
    %c0_i32_8 = arith.constant 0 : i32
    %26 = vector.broadcast %c0_i32_8 : i32 to vector<8x1xi32>
    %27 = arith.cmpi eq, %25, %26 : vector<8x1xi32>
    %c1_i32_9 = arith.constant 1 : i32
    %28 = vector.broadcast %c1_i32_9 : i32 to vector<8x1xi32>
    %29 = arith.cmpi eq, %25, %28 : vector<8x1xi32>
    %cst = arith.constant 4.98246193 : f32
    %cst_10 = arith.constant 4.93827152 : f32
    %30 = vector.broadcast %cst : f32 to vector<8x1xf32>
    %31 = vector.broadcast %cst_10 : f32 to vector<8x1xf32>
    %32 = arith.select %29, %30, %31 : vector<8x1xi1>, vector<8x1xf32>
    %cst_11 = arith.constant 4.76726246 : f32
    %33 = vector.broadcast %cst_11 : f32 to vector<8x1xf32>
    %34 = arith.select %27, %33, %32 : vector<8x1xi1>, vector<8x1xf32>
    %c0_12 = arith.constant 0 : index
    %c0_13 = arith.constant 0 : index
    %35 = vector.load %arg5[%c0_12, %c0_13] : memref<8x256xf32, #tpu.memory_space<vmem>>, vector<8x256xf32>
    %36 = arith.mulf %5, %5 : vector<8x256xf32>
    %37 = vector.broadcast %34 : vector<8x1xf32> to vector<8x256xf32>
    %38 = arith.mulf %36, %37 : vector<8x256xf32>
    %39 = arith.addf %35, %38 : vector<8x256xf32>
    %c0_14 = arith.constant 0 : index
    %c0_15 = arith.constant 0 : index
    %40 = vector.load %arg5[%c0_14, %c0_15] : memref<8x256xf32, #tpu.memory_space<vmem>>, vector<8x256xf32>
    tpu.vector_store %arg5[%c0_14, %c0_15], %39 {strides = array<i32>} : memref<8x256xf32, #tpu.memory_space<vmem>>, vector<8x256xf32>,
    %c0_i32_16 = arith.constant 0 : i32
    %41 = arith.cmpi eq, %arg1, %c0_i32_16 : i32
    %42 = arith.extui %41 : i1 to i32
    %c0_i32_17 = arith.constant 0 : i32
    %43 = arith.cmpi ne, %42, %c0_i32_17 : i32
    scf.if %43 {
      %c0_18 = arith.constant 0 : index
      %c0_19 = arith.constant 0 : index
      %44 = vector.load %arg5[%c0_18, %c0_19] : memref<8x256xf32, #tpu.memory_space<vmem>>, vector<8x256xf32>
      %45 = vector.shape_cast %44 : vector<8x256xf32> to vector<1x8x256xf32>
      %cst_20 = arith.constant dense<0.000000e+00> : vector<1xf32>
      %46 = vector.multi_reduction <add>, %45, %cst_20 [1, 2] : vector<1x8x256xf32> to vector<1xf32>
      %47 = vector.shape_cast %46 : vector<1xf32> to vector<1x1x1xf32>
      %48 = vector.extract %47[0, 0, 0] : f32 from vector<1x1x1xf32>
      %49 = vector.broadcast %48 : f32 to vector<1x8x128xf32>
      %c0_21 = arith.constant 0 : index
      %c0_22 = arith.constant 0 : index
      %c0_23 = arith.constant 0 : index
      %50 = vector.load %arg4[%c0_21, %c0_22, %c0_23] : memref<1x8x128xf32, #tpu.memory_space<vmem>>, vector<1x8x128xf32>
      tpu.vector_store %arg4[%c0_21, %c0_22, %c0_23], %49 {strides = array<i32>} : memref<1x8x128xf32, #tpu.memory_space<vmem>>, vector<1x8x128xf32>,
    } else {
    }
    return
  }
  func.func @transform_0(%arg0: i32, %arg1: i32) -> (i32, i32) {
    %c0_i32 = arith.constant 0 : i32
    return %arg0, %arg1 : i32, i32
  }
  func.func @transform_1(%arg0: i32, %arg1: i32) -> (i32, i32) {
    %c0_i32 = arith.constant 0 : i32
    return %arg0, %arg1 : i32, i32
  }
  func.func @transform_2(%arg0: i32, %arg1: i32) -> (i32, i32, i32) {
    %c0_i32 = arith.constant 0 : i32
    %c0_i32_0 = arith.constant 0 : i32
    %c0_i32_1 = arith.constant 0 : i32
    return %arg0, %c0_i32, %c0_i32_0 : i32, i32, i32
  }
}

</mosaic_0001>

<bundles_post_ra>
// kernel: tpu_custom_call.1
= control target key start
LH: loop header
LB: loop body
LE: loop exit
PB: predicated region body
PF: predicated region fallthrough
CT: control target
= control target key end

     0   :  { %7 = vsyncpa [#allocation4], 0  ;;  %s255_s0 = inlined_call_operand.hbm [shape: f32[8,256], index: 0, kind: input, shape index: {}]   ;;  %s256_s1 = inlined_call_operand.hbm [shape: f32[8,256], index: 1, kind: input, shape index: {}]   ;;  %s257_s2 = inlined_call_operand.hbm [shape: f32[1,8,128], index: 2, kind: output, shape index: {}]  }
   0x1   :  { %8 = vsyncpa [#allocation7], 0 }
   0x2   :  { %9 = vsyncpa [#allocation5], 0  ;;  %s196_s9 = smov [#allocation3]   ;;  %s197_s11 = smov [#allocation6]  }
   0x3   :  { %s16_s10 = sshll.u32 %s196_s9, 4  ;;  %s26_s12 = sshll.u32 %s197_s11, 4  ;;  %s17_s10 = int_to_ptr.vmem [resolvable:$true] %s16_s10  ;;  %s27_s12 = int_to_ptr.vmem [resolvable:$true] %s26_s12 }
   0x4   :  { %s124_s15 = scalar_lea.hbm %s255_s0, 256 }
   0x5   :  { %p125_p0 = scmp.ne.s32.totalorder %s255_s0, %s124_s15  ;;  %p128_p1 = scmp.lt.u32.totalorder %s124_s15, %s255_s0 }
   0x7   :  { %p130_p2 = pnand %p128_p1, %p125_p0 }
   0x9   :  { %133 = shalt.err (!%p130_p2)
}
   0xa   :  { %s134_s20 = scalar_lea.vmem %s17_s10, 256  ;;  %p139_p4 = scmp.lt.s32.totalorder %s17_s10, %s17_s10 }
   0xb   :  { %p135_p3 = scmp.ne.s32.totalorder %s17_s10, %s134_s20  ;;  %p140_p5 = scmp.lt.s32.totalorder %s134_s20, %s134_s20 }
   0xd   :  { %p141_p6 = por %p140_p5, %p139_p4 }
   0xf   :  { %p142_p7 = pnand %p141_p6, %p135_p3 }
  0x11   :  { %145 = shalt.err (!%p142_p7)
}
  0x12   :  { %19 = dma.hbm_to_vmem [thread:$0]  %s255_s0, 256, %s17_s10, [#allocation4]  }
  0x13   :  { %s146_s25 = scalar_lea.hbm %s256_s1, 256 }
  0x14   :  { %p147_p8 = scmp.ne.s32.totalorder %s256_s1, %s146_s25  ;;  %p150_p9 = scmp.lt.u32.totalorder %s146_s25, %s256_s1 }
  0x16   :  { %p152_p10 = pnand %p150_p9, %p147_p8 }
  0x18   :  { %155 = shalt.err (!%p152_p10)
}
  0x19   :  { %s156_s30 = scalar_lea.vmem %s27_s12, 256  ;;  %p161_p12 = scmp.lt.s32.totalorder %s27_s12, %s27_s12 }
  0x1a   :  { %p157_p11 = scmp.ne.s32.totalorder %s27_s12, %s156_s30  ;;  %p162_p13 = scmp.lt.s32.totalorder %s156_s30, %s156_s30 }
  0x1c   :  { %p163_p0 = por %p162_p13, %p161_p12 }
  0x1e   :  { %p164_p1 = pnand %p163_p0, %p157_p11 }
  0x20   :  { %167 = shalt.err (!%p164_p1)
}
  0x21   :  { %29 = dma.hbm_to_vmem [thread:$0]  %s256_s1, 256, %s27_s12, [#allocation7]  }
  0x22   :  { %190 = dma.done.wait [#allocation4], 256  }
  0x23   :  { %191 = vsyncadd [#allocation4], 4294967040 }
  0x24   :  { %192 = dma.done.wait [#allocation7], 256  }
  0x25   :  { %193 = vsyncadd [#allocation7], 4294967040  ;;  %v48_v0 = vlaneseq  ;;  %v42_v4 = vld [vmem:[#allocation3] sm:$0xff]  ;;  %v43_v6 = vld [vmem:[#allocation3 + $0x8] sm:$0xff]  ;;  %v198_v17 = vmov 4.9382715  }
  0x26   :  { %v44_v7 = vld [vmem:[#allocation6] sm:$0xff]  ;;  %v45_v8 = vld [vmem:[#allocation6 + $0x8] sm:$0xff]  ;;  %s199_s1 = smov [#allocation8]  }
  0x27   :  { %v49_v1 = vshrl.u32 %v48_v0, 7  ;;  %v46_v10 = vsub.f32 %v42_v4, %v44_v7  ;;  %v47_v11 = vsub.f32 %v43_v6, %v45_v8  ;;  %s106_s4 = sshll.u32 %s199_s1, 4  ;;  %s107_s4 = int_to_ptr.vmem [resolvable:$true] %s106_s4 }
  0x28   :  { %s168_s6 = scalar_lea.vmem %s107_s4, 128  ;;  %p173_p3 = scmp.lt.s32.totalorder %s107_s4, %s107_s4 }
  0x29   :  { %v239_v2 = vmul.u32.u64.low 2863311531, %v49_v1  ;;  %v240_v3 = vmul.u32.u64.high 2863311531, %v49_v1, %v239_v2  ;;  %v75_v15 = vmul.f32 %v46_v10, %v46_v10  ;;  %v76_v16 = vmul.f32 %v47_v11, %v47_v11  ;;  %p169_p2 = scmp.ne.s32.totalorder %s107_s4, %s168_s6  ;;  %p174_p4 = scmp.lt.s32.totalorder %s168_s6, %s168_s6 }
  0x2b   :  { %v59_v5 = vshrl.u32 %v240_v3, 1  ;;  %p175_p5 = por %p174_p4, %p173_p3 }
  0x2d   :  { %v60_v9 = vmul.u32 3, %v59_v5  ;;  %p176_p6 = pnand %p175_p5, %p169_p2 }
  0x2f   :  { %v61_v12 = vsub.s32 %v49_v1, %v60_v9 }
  0x31   :  { %vm64_vm0 = vcmp.ne.s32.totalorder %v61_v12, 0  ;;  %vm65_vm1 = vcmp.lt.s32.totalorder %v61_v12, 0  ;;  %v67_v13 = vadd.s32 3, %v61_v12 }
  0x32   :  { %vm66_vm2 = vmand %vm65_vm1, %vm64_vm0 }
  0x33   :  { %v68_v14 = vsel %vm66_vm2, %v67_v13, %v61_v12 }
  0x34   :  { %vm69_vm3 = vcmp.eq.s32.totalorder %v68_v14, 0  ;;  %vm70_vm4 = vcmp.eq.s32.totalorder %v68_v14, 1 }
  0x35   :  { %v71_v18 = vsel %vm70_vm4, 4.982462, %v198_v17 }
  0x36   :  { %v72_v19 = vsel %vm69_vm3, 4.7672625, %v71_v18 }
  0x37   :  { %v77_v20 = vmul.f32 %v75_v15, %v72_v19  ;;  %v78_v21 = vmul.f32 %v76_v16, %v72_v19 }
  0x39   :  { %v88_v22 = vadd.f32 %v78_v21, %v77_v20 }
  0x3b   :  { %89 = vadd.xlane.f32.xlu0 %v88_v22 }
  0xc8   :  { %v90_v23 = vpop.xlane.xlu0 %89 }
  0xc9   :  { %v91_v24 = vrot.slane %v90_v23, 4 }
  0xcb   :  { %v92_v25 = vadd.f32 %v91_v24, %v90_v23 }
  0xcd   :  { %v93_v26 = vrot.slane %v92_v25, 2 }
  0xcf   :  { %v94_v27 = vadd.f32 %v93_v26, %v92_v25 }
  0xd1   :  { %v95_v28 = vrot.slane %v94_v27, 1 }
  0xd3   :  { %v96_v29 = vadd.f32 %v95_v28, %v94_v27 }
  0xd5   :  { %118 = vpush %v96_v29 }
 0x106   :  { %s119_s5 = spop %118 }
 0x107   :  { %v98_v30 = vstv %s119_s5 }
 0x108   :  { %99 = vst [vmem:[#allocation8] sm:$0xff] %v98_v30 }
 0x109   :  { %179 = shalt.err (!%p176_p6)
}
 0x10a   :  { %s180_s9 = scalar_lea.hbm %s257_s2, 128 }
 0x10b   :  { %p181_p7 = scmp.ne.s32.totalorder %s257_s2, %s180_s9  ;;  %p184_p8 = scmp.lt.u32.totalorder %s180_s9, %s257_s2 }
 0x10d   :  { %p186_p9 = pnand %p184_p8, %p181_p7 }
 0x10f   :  { %189 = shalt.err (!%p186_p9)
}
 0x110   :  { %109 = dma.vmem_to_hbm [thread:$0]  %s107_s4, 128, %s257_s2, [#allocation5]  }
 0x111   :  { %194 = dma.done.wait [#allocation5], 128  }
 0x112   :  { %195 = vsyncadd [#allocation5], 4294967168 }
 0x113   :  { %113 = vsyncpa [#allocation4], 1 }
 0x114   :  { %114 = vsyncpa [#allocation7], 1 }
 0x115   :  { %115 = vsyncpa [#allocation5], 1 }

</bundles_post_ra>
